<compile_context>
chip_gen: v6e
topology: v6e:2x2x1
jax: 0.10.0
libtpu: 0.0.40
codegen_flags: <defaults>
</compile_context>

<pallas_src>
import functools

import jax
import jax.numpy as jnp
from jax.experimental import pallas as pl
from jax.experimental.pallas import tpu as pltpu


def _round_up(n: int, m: int) -> int:
    return ((n + m - 1) // m) * m


def _pad8(n: int) -> int:
    return _round_up(n, 8)


def _pad128(n: int) -> int:
    return _round_up(n, 128)


def _apply_activation(h, activation_type: int):
    if activation_type == 0:
        return jnp.maximum(h, 0.0)                 # relu
    elif activation_type == 1:
        return jnp.tanh(h)                         # tanh (EUP)
    elif activation_type == 2:
        return jnp.where(h >= 0.0, h, 0.01 * h)    # leaky_relu (default slope 0.01)
    return h                                       # identity (PyTorch `else: return x`)


def _mlp_logsoftmax_kernel(x_ref, w1_ref, b1_ref, w2_ref, b2_ref, o_ref,
                           *, activation_type: int):
    """Fused per-batch-tile: (x @ W1 + b1) -> act -> (@ W2 + b2) -> log_softmax(axis=1)."""
    # fc1: cast the f32 x tile to bf16 in-VMEM (no extra HBM pass), f32 MXU accumulation.
    x_bf = x_ref[...].astype(jnp.bfloat16)
    h = jnp.dot(x_bf, w1_ref[...], preferred_element_type=jnp.float32) + b1_ref[...]
    h = _apply_activation(h, activation_type)      # f32 activation (v5e-safe)

    # fc2: bf16 x bf16 -> single-pass MXU, f32 accumulation; bias add in f32.
    logits = jnp.dot(h.astype(jnp.bfloat16), w2_ref[...],
                     preferred_element_type=jnp.float32) + b2_ref[...]

    # numerically stable log_softmax over the class axis (dim=1), all f32.
    m = jnp.max(logits, axis=-1, keepdims=True)
    shifted = logits - m
    lse = jnp.log(jnp.sum(jnp.exp(shifted), axis=-1, keepdims=True))
    o_ref[...] = (shifted - lse).astype(o_ref.dtype)


def _fused_linear_logsoftmax_kernel(x_ref, w_ref, b_ref, o_ref):
    """Identity-activation fast path: single (folded) matmul + log_softmax."""
    x_bf = x_ref[...].astype(jnp.bfloat16)
    logits = jnp.dot(x_bf, w_ref[...], preferred_element_type=jnp.float32) + b_ref[...]
    m = jnp.max(logits, axis=-1, keepdims=True)
    shifted = logits - m
    lse = jnp.log(jnp.sum(jnp.exp(shifted), axis=-1, keepdims=True))
    o_ref[...] = (shifted - lse).astype(o_ref.dtype)


def my_model_forward(x, w1, b1, w2, b2, activation_type=0, *, block_b=None):
    """x: (B, input_dim) f32. Returns (B, 4) f32 log-probabilities.

    block_b: optional hard cap on the batch tile (mostly for tests); None = auto-tune.
    """
    B, D = x.shape
    H = w1.shape[1]
    O = w2.shape[1]
    assert w1.shape == (D, H) and b1.shape == (1, H)
    assert w2.shape == (H, O) and b2.shape == (1, O)

    # Per the PyTorch spec, any activation_type outside {0,1,2} is identity (`else: return x`),
    # so folding fc1 into fc2 is semantics-preserving for those codes.
    identity = activation_type not in (0, 1, 2)

    # ---------------- batch-tile selection ----------------
    # (a) stream target: >= ~2 MiB of f32 x per grid step (amortizes ~0.35us/step overhead).
    tb = _round_up(max(512, (2 * 1024 * 1024) // max(D * 4, 1)), 16)
    # (b) keep >= 2 grid steps when B allows, so ("parallel",) shards batch over v7x's 2 TCs.
    tb = min(tb, _round_up(pl.cdiv(B, 2), 16))
    # (c) optional user / test cap.
    if block_b is not None:
        tb = min(tb, _round_up(block_b, 16))
    tb = max(tb, 16)

    # (d) VMEM budget (per TensorCore): double-buffered x/out tiles, resident weights
    #     (conservatively counted double-buffered), f32 intermediate. Shrink TB until it fits.
    try:
        vmem_cap = int(getattr(pltpu.get_tpu_info(), "vmem_capacity_bytes"))
    except Exception:
        vmem_cap = 64 * 1024 * 1024  # conservative: v7x per-TC physical VMEM
    budget = int(vmem_cap * 0.7)

    def _vmem_need(t):
        need = 2 * t * _pad128(D) * 4                    # x tile, double-buffered (f32)
        need += 2 * t * _pad128(O) * 4                   # out tile, double-buffered (f32)
        if identity:
            need += 2 * _pad8(D) * _pad128(O) * 2        # folded weight (bf16)
            need += 2 * 8 * _pad128(O) * 4               # folded bias
        else:
            need += 2 * _pad8(D) * _pad128(H) * 2        # w1 (bf16)
            need += 2 * 8 * _pad128(H) * 4               # b1
            need += 2 * _pad8(H) * _pad128(O) * 2        # w2 (bf16)
            need += 2 * 8 * _pad128(O) * 4               # b2
            need += t * _pad128(H) * 4                   # h intermediate (f32)
        return need

    while _vmem_need(tb) > budget and tb > 16:
        tb = max(16, _round_up(tb // 2, 16))
    TB = tb

    B_pad = _round_up(B, TB)
    if B_pad != B:
        # Zero pad rows flow through exp/log_softmax -> finite values, sliced off below.
        x = jnp.pad(x, ((0, B_pad - B), (0, 0)))
    grid = (B_pad // TB,)

    compiler_params = pltpu.CompilerParams(
        dimension_semantics=("parallel",),   # megacore-shard the batch axis on v7x
        vmem_limit_bytes=budget,
    )

    x_spec = pl.BlockSpec((TB, D), lambda i: (i, 0))       # streamed / pipelined batch tile
    out_spec = pl.BlockSpec((TB, O), lambda i: (i, 0))

    # Resident weights/biases: constant index_map. When the weight copy is large enough to
    # matter (>= 1 MiB), try Buffered(1) to drop the dead second buffer; plain spec fallback.
    weight_copy_bytes = (_pad8(D) * _pad128(O if identity else H) * 2
                         + (0 if identity else _pad8(H) * _pad128(O) * 2))
    try_single_buffer = weight_copy_bytes >= (1 << 20)

    def _resident(shape, single_buffer):
        if single_buffer:
            return pl.BlockSpec(shape, lambda i: (0,) * len(shape),
                                pipeline_mode=pl.Buffered(1))
        return pl.BlockSpec(shape, lambda i: (0,) * len(shape))

    if identity:
        w_eff = (w1 @ w2).astype(jnp.bfloat16)          # (D, O) folded weight
        b_eff = (b1 @ w2 + b2).astype(jnp.float32)      # (1, O) folded bias
        cost = pl.CostEstimate(
            flops=2 * B_pad * D * O,
            transcendentals=B_pad * (O + 1),
            bytes_accessed=x.size * 4 + w_eff.size * 2 + b_eff.size * 4 + B_pad * O * 4,
        )

        def _call(single_buffer):
            return pl.pallas_call(
                _fused_linear_logsoftmax_kernel,
                out_shape=jax.ShapeDtypeStruct((B_pad, O), jnp.float32),
                grid_spec=pltpu.PrefetchScalarGridSpec(
                    num_scalar_prefetch=0,
                    grid=grid,
                    in_specs=[x_spec,
                              _resident((D, O), single_buffer),
                              _resident((1, O), single_buffer)],
                    out_specs=out_spec,
                ),
                compiler_params=compiler_params,
                cost_estimate=cost,
            )(x, w_eff, b_eff)
    else:
        w1_bf = w1.astype(jnp.bfloat16)
        w2_bf = w2.astype(jnp.bfloat16)
        kernel = functools.partial(_mlp_logsoftmax_kernel,
                                   activation_type=activation_type)
        n_trans = B_pad * (O + 1) + (B_pad * H if activation_type == 1 else 0)
        cost = pl.CostEstimate(
            flops=2 * B_pad * (D * H + H * O),
            transcendentals=n_trans,
            bytes_accessed=(x.size * 4 + w1_bf.size * 2 + b1.size * 4
                            + w2_bf.size * 2 + b2.size * 4 + B_pad * O * 4),
        )

        def _call(single_buffer):
            return pl.pallas_call(
                kernel,
                out_shape=jax.ShapeDtypeStruct((B_pad, O), jnp.float32),
                grid_spec=pltpu.PrefetchScalarGridSpec(
                    num_scalar_prefetch=0,
                    grid=grid,
                    in_specs=[x_spec,
                              _resident((D, H), single_buffer),
                              _resident((1, H), single_buffer),
                              _resident((H, O), single_buffer),
                              _resident((1, O), single_buffer)],
                    out_specs=out_spec,
                ),
                compiler_params=compiler_params,
                cost_estimate=cost,
            )(x, w1_bf, b1, w2_bf, b2)

    if try_single_buffer:
        try:
            out = _call(single_buffer=True)
        except Exception:
            out = _call(single_buffer=False)
    else:
        out = _call(single_buffer=False)
    return out[:B]


def _reference_forward(x, w1, b1, w2, b2, activation_type=0):
    """Pure-JAX reference matching the kernel's bf16-matmul / f32-accumulate numerics."""
    h = jnp.dot(x.astype(jnp.bfloat16), w1.astype(jnp.bfloat16),
                preferred_element_type=jnp.float32) + b1
    h = _apply_activation(h, activation_type)
    logits = jnp.dot(h.astype(jnp.bfloat16), w2.astype(jnp.bfloat16),
                     preferred_element_type=jnp.float32) + b2
    return jax.nn.log_softmax(logits, axis=1)


def _reference_forward_f32(x, w1, b1, w2, b2, activation_type=0):
    h = _apply_activation(x @ w1 + b1, activation_type)
    return jax.nn.log_softmax(h @ w2 + b2, axis=1)


if __name__ == "__main__":
    # Small shapes consistent with the module: flattened image -> hidden -> 4 classes.
    batch, input_dim, hidden_units, num_classes = 8, 64, 32, 4

    key = jax.random.PRNGKey(0)
    kx, k1, kb1, k2, kb2, kx2 = jax.random.split(key, 6)

    x = jax.random.normal(kx, (batch, input_dim), dtype=jnp.float32)

    # PyTorch-Linear-style init: U(-1/sqrt(fan_in), 1/sqrt(fan_in)).
    lim1 = 1.0 / jnp.sqrt(jnp.float32(input_dim))
    w1 = jax.random.uniform(k1, (input_dim, hidden_units), jnp.float32, -lim1, lim1)
    b1 = jax.random.uniform(kb1, (1, hidden_units), jnp.float32, -lim1, lim1)

    lim2 = 1.0 / jnp.sqrt(jnp.float32(hidden_units))
    w2 = jax.random.uniform(k2, (hidden_units, num_classes), jnp.float32, -lim2, lim2)
    b2 = jax.random.uniform(kb2, (1, num_classes), jnp.float32, -lim2, lim2)

    # --- main check: relu path ---
    out = jax.block_until_ready(my_model_forward(x, w1, b1, w2, b2, activation_type=0))
    ref = _reference_forward(x, w1, b1, w2, b2, activation_type=0)
    assert out.shape == (batch, num_classes)
    assert jnp.allclose(out, ref, atol=2e-3, rtol=2e-3), "relu mismatch vs bf16-matched reference"
    assert jnp.allclose(out, _reference_forward_f32(x, w1, b1, w2, b2, 0),
                        atol=5e-2, rtol=5e-2), "relu mismatch vs f32 reference"

    # --- tanh path (exercises EUP activation) ---
    out_t = jax.block_until_ready(my_model_forward(x, w1, b1, w2, b2, activation_type=1))
    ref_t = _reference_forward(x, w1, b1, w2, b2, activation_type=1)
    assert jnp.allclose(out_t, ref_t, atol=2e-3, rtol=2e-3), "tanh mismatch"

    # --- multi-tile check: exercises batch tiling + padding (TB=16, B_pad=48, grid=3) ---
    x2 = jax.random.normal(kx2, (40, input_dim), dtype=jnp.float32)
    out2 = jax.block_until_ready(
        my_model_forward(x2, w1, b1, w2, b2, activation_type=0, block_b=16))
    ref2 = _reference_forward(x2, w1, b1, w2, b2, activation_type=0)
    assert out2.shape == (40, num_classes)
    assert jnp.allclose(out2, ref2, atol=2e-3, rtol=2e-3), "multi-tile mismatch"

    # --- identity-activation fast path (folded weights, single-matmul kernel) ---
    out3 = jax.block_until_ready(my_model_forward(x, w1, b1, w2, b2, activation_type=7))
    ref3 = _reference_forward_f32(x, w1, b1, w2, b2, activation_type=7)
    assert jnp.allclose(out3, ref3, atol=5e-2, rtol=5e-2), "identity fast-path mismatch"

    print("KERNEL_OK")
</pallas_src>

<mosaic_0001>
module attributes {stable_mosaic.version = 11 : i64} {
  func.func @_mlp_logsoftmax_kernel(%arg0: i32, %arg1: memref<16x64xf32, #tpu.memory_space<vmem>>, %arg2: memref<64x32xbf16, #tpu.memory_space<vmem>>, %arg3: memref<1x32xf32, #tpu.memory_space<vmem>>, %arg4: memref<32x4xbf16, #tpu.memory_space<vmem>>, %arg5: memref<1x4xf32, #tpu.memory_space<vmem>>, %arg6: memref<16x4xf32, #tpu.memory_space<vmem>>) attributes {dimension_semantics = [#tpu.dimension_semantics<parallel>], iteration_bounds = array<i64: 1>, scalar_prefetch = 0 : i64, scratch_operands = 0 : i64, tpu.core_type = #tpu.core_type<tc>, window_params = [{transform_indices = @transform_0, window_bounds = array<i64: 16, 64>}, {pipeline_mode = #tpu.pipeline_mode<synchronous>, transform_indices = @transform_1, window_bounds = array<i64: 64, 32>}, {pipeline_mode = #tpu.pipeline_mode<synchronous>, transform_indices = @transform_2, window_bounds = array<i64: 1, 32>}, {pipeline_mode = #tpu.pipeline_mode<synchronous>, transform_indices = @transform_3, window_bounds = array<i64: 32, 4>}, {pipeline_mode = #tpu.pipeline_mode<synchronous>, transform_indices = @transform_4, window_bounds = array<i64: 1, 4>}, {transform_indices = @transform_5, window_bounds = array<i64: 16, 4>}]} {
    %c0 = arith.constant 0 : index
    %c0_0 = arith.constant 0 : index
    %0 = vector.load %arg1[%c0, %c0_0] : memref<16x64xf32, #tpu.memory_space<vmem>>, vector<16x64xf32>
    %1 = arith.truncf %0 : vector<16x64xf32> to vector<16x64xbf16>
    %c0_1 = arith.constant 0 : index
    %c0_2 = arith.constant 0 : index
    %2 = vector.load %arg2[%c0_1, %c0_2] : memref<64x32xbf16, #tpu.memory_space<vmem>>, vector<64x32xbf16>
    %cst = arith.constant dense<0.000000e+00> : vector<16x32xf32>
    %3 = tpu.matmul %1, %2, %cst {dimension_numbers = #tpu.dot_dimension_numbers<[1], [0], [0], [1], [0, 0, 1, 1], [], []>} : vector<16x64xbf16>, vector<64x32xbf16>, vector<16x32xf32> -> vector<16x32xf32>
    %c0_3 = arith.constant 0 : index
    %c0_4 = arith.constant 0 : index
    %4 = vector.load %arg3[%c0_3, %c0_4] : memref<1x32xf32, #tpu.memory_space<vmem>>, vector<1x32xf32>
    %5 = vector.broadcast %4 : vector<1x32xf32> to vector<16x32xf32>
    %6 = arith.addf %3, %5 : vector<16x32xf32>
    %cst_5 = arith.constant 0.000000e+00 : f32
    %7 = vector.broadcast %cst_5 : f32 to vector<16x32xf32>
    %8 = arith.maximumf %6, %7 : vector<16x32xf32>
    %9 = arith.truncf %8 : vector<16x32xf32> to vector<16x32xbf16>
    %c0_6 = arith.constant 0 : index
    %c0_7 = arith.constant 0 : index
    %10 = vector.load %arg4[%c0_6, %c0_7] : memref<32x4xbf16, #tpu.memory_space<vmem>>, vector<32x4xbf16>
    %cst_8 = arith.constant dense<0.000000e+00> : vector<16x4xf32>
    %11 = tpu.matmul %9, %10, %cst_8 {dimension_numbers = #tpu.dot_dimension_numbers<[1], [0], [0], [1], [0, 0, 1, 1], [], []>} : vector<16x32xbf16>, vector<32x4xbf16>, vector<16x4xf32> -> vector<16x4xf32>
    %c0_9 = arith.constant 0 : index
    %c0_10 = arith.constant 0 : index
    %12 = vector.load %arg5[%c0_9, %c0_10] : memref<1x4xf32, #tpu.memory_space<vmem>>, vector<1x4xf32>
    %13 = vector.broadcast %12 : vector<1x4xf32> to vector<16x4xf32>
    %14 = arith.addf %11, %13 : vector<16x4xf32>
    %cst_11 = arith.constant dense<0xFF800000> : vector<16xf32>
    %15 = vector.multi_reduction <maximumf>, %14, %cst_11 [1] : vector<16x4xf32> to vector<16xf32>
    %16 = vector.shape_cast %15 : vector<16xf32> to vector<16x1xf32>
    %17 = vector.broadcast %16 : vector<16x1xf32> to vector<16x4xf32>
    %18 = arith.subf %14, %17 : vector<16x4xf32>
    %19 = math.exp %18 : vector<16x4xf32>
    %cst_12 = arith.constant dense<0.000000e+00> : vector<16xf32>
    %20 = vector.multi_reduction <add>, %19, %cst_12 [1] : vector<16x4xf32> to vector<16xf32>
    %21 = vector.shape_cast %20 : vector<16xf32> to vector<16x1xf32>
    %22 = math.log %21 : vector<16x1xf32>
    %23 = vector.broadcast %22 : vector<16x1xf32> to vector<16x4xf32>
    %24 = arith.subf %18, %23 : vector<16x4xf32>
    %c0_13 = arith.constant 0 : index
    %c0_14 = arith.constant 0 : index
    %25 = vector.load %arg6[%c0_13, %c0_14] : memref<16x4xf32, #tpu.memory_space<vmem>>, vector<16x4xf32>
    tpu.vector_store %arg6[%c0_13, %c0_14], %24 {strides = array<i32>} : memref<16x4xf32, #tpu.memory_space<vmem>>, vector<16x4xf32>,
    return
  }
  func.func @transform_0(%arg0: i32) -> (i32, i32) {
    %c0_i32 = arith.constant 0 : i32
    %c0_i32_0 = arith.constant 0 : i32
    return %arg0, %c0_i32 : i32, i32
  }
  func.func @transform_1(%arg0: i32) -> (i32, i32) {
    %c0_i32 = arith.constant 0 : i32
    %c0_i32_0 = arith.constant 0 : i32
    %c0_i32_1 = arith.constant 0 : i32
    return %c0_i32, %c0_i32_0 : i32, i32
  }
  func.func @transform_2(%arg0: i32) -> (i32, i32) {
    %c0_i32 = arith.constant 0 : i32
    %c0_i32_0 = arith.constant 0 : i32
    %c0_i32_1 = arith.constant 0 : i32
    return %c0_i32, %c0_i32_0 : i32, i32
  }
  func.func @transform_3(%arg0: i32) -> (i32, i32) {
    %c0_i32 = arith.constant 0 : i32
    %c0_i32_0 = arith.constant 0 : i32
    %c0_i32_1 = arith.constant 0 : i32
    return %c0_i32, %c0_i32_0 : i32, i32
  }
  func.func @transform_4(%arg0: i32) -> (i32, i32) {
    %c0_i32 = arith.constant 0 : i32
    %c0_i32_0 = arith.constant 0 : i32
    %c0_i32_1 = arith.constant 0 : i32
    return %c0_i32, %c0_i32_0 : i32, i32
  }
  func.func @transform_5(%arg0: i32) -> (i32, i32) {
    %c0_i32 = arith.constant 0 : i32
    %c0_i32_0 = arith.constant 0 : i32
    return %arg0, %c0_i32 : i32, i32
  }
}

</mosaic_0001>

<bundles_post_ra>
// kernel: tpu_custom_call.1
= control target key start
LH: loop header
LB: loop body
LE: loop exit
PB: predicated region body
PF: predicated region fallthrough
CT: control target
= control target key end

     0   :  { %v264_v0 = vmov 0.0   ;;  %vm265_vm0 = vmmov 0   ;;  %vm63_vm1 = vcmask 523264   ;;  %vm134_vm2 = vcmask 261120   ;;  %s338_s1 = inlined_call_operand.vmem [shape: bf16[64,32], index: 1, kind: input, shape index: {}]   ;;  %s339_s0 = inlined_call_operand.vmem [shape: f32[16,64], index: 0, kind: input, shape index: {}]   ;;  %s340_s3 = inlined_call_operand.vmem [shape: bf16[32,4], index: 3, kind: input, shape index: {}]   ;;  %s341_s2 = inlined_call_operand.vmem [shape: f32[1,32], index: 2, kind: input, shape index: {}]   ;;  %s342_s4 = inlined_call_operand.vmem [shape: f32[1,4], index: 4, kind: input, shape index: {}]   ;;  %s343_s5 = inlined_call_operand.vmem [shape: f32[16,4], index: 5, kind: output, shape index: {}]  }
   0x1   :  { %228 = vmatprep.subr.bf16.mxu0 %v264_v0  ;;  %v250_v1 = vld [vmem:[%s338_s1 + $0x18] sm:$0xff]   ;;  %236 = vmatprep.mubr.msk.bf16.mxu0 %vm265_vm0, %v264_v0  ;;  %v251_v2 = vld [vmem:[%s338_s1 + $0x10] sm:$0xff]   ;;  %v252_v3 = vld [vmem:[%s338_s1 + $0x8] sm:$0xff]   ;;  %vm179_vm3 = vcmask 31744  }
   0x2   :  { %240 = vmatprep.subr.bf16.mxu1 %v264_v0  ;;  %244 = vmatprep.mubr.msk.bf16.mxu1 %vm265_vm0, %v264_v0  ;;  %v253_v4 = vld [vmem:[%s338_s1] sm:$0xff]   ;;  %v22_v6 = vld [vmem:[%s339_s0 + $0x8] sm:$0xff] }
   0x3   :  { %229 = vmatpush3.bf16.msra.mxu0 %v250_v1  ;;  %v21_v5 = vld [vmem:[%s339_s0] sm:$0xff]  ;;  %v254_v8 = vld [vmem:[%s340_s3 + $0x8] sm:$0xff]  }
   0x4   :  { %230 = vmatprep.subr.bf16.mxu0 %v264_v0  ;;  %v23_v7 = vpack.c.bf16 %v22_v6, %v21_v5  ;;  %241 = vmatpush3.bf16.msra.mxu1 %v254_v8  ;;  %v255_v9 = vld [vmem:[%s340_s3] sm:$0xff]  }
   0x5   :  { %242 = vmatprep.subr.bf16.mxu1 %v264_v0  ;;  %v210_v10 = vld [vmem:[%s341_s2] ss:$0 sm:$0xff] }
   0x6   :  { %v216_v20 = vld [vmem:[%s342_s4] ss:$0 sm:$0xff] }
   0x7   :  { %231 = vmatpush3.bf16.msra.mxu0 %v251_v2 }
   0x8   :  { %232 = vmatprep.subr.bf16.mxu0 %v264_v0  ;;  %243 = vmatpush3.bf16.msra.mxu1 %v255_v9 }
   0xb   :  { %233 = vmatpush3.bf16.msra.mxu0 %v252_v3 }
   0xc   :  { %234 = vmatprep.subr.bf16.mxu0 %v264_v0 }
   0xf   :  { %235 = vmatpush3.bf16.msra.mxu0 %v253_v4 }
  0x12   :  { %237 = vmatmul.mubr.msk.bf16.vlgmr.msra.gmra.mxu0 %vm63_vm1, %v23_v7 }
  0xd2   :  { %v101_v11 = vpop.f32.mrf.mxu0 }
  0xd3   :  { %v102_v13 = vadd.f32 %v210_v10, %v101_v11 }
  0xd4   :  { %v238_v12 = vpop.f32.mrf.mxu0 }
  0xd5   :  { %v108_v17 = vmax.f32 %v102_v13, 0.0 }
  0xd6   :  { %v104_v14 = vpop.f32.mrf.mxu0 }
  0xd7   :  { %v105_v15 = vadd.f32 %v210_v10, %v104_v14 }
  0xd8   :  { %v239_v16 = vpop.f32.mrf.mxu0 }
  0xd9   :  { %v109_v18 = vmax.f32 %v105_v15, 0.0 }
  0xdb   :  { %v110_v19 = vpack.c.bf16 %v109_v18, %v108_v17 }
  0xdd   :  { %245 = vmatmul.mubr.msk.bf16.vlgmr.msra.gmra.mxu1 %vm134_vm2, %v110_v19 }
 0x19d   :  { %v172_v21 = vpop.f32.mrf.mxu1 }
 0x19e   :  { %v173_v22 = vadd.f32 %v216_v20, %v172_v21 }
 0x19f   :  { %v246_v23 = vpop.f32.mrf.mxu1 }
 0x1a0   :  { %v180_v24 = vsel %vm179_vm3, %v173_v22, -inf }
 0x1a1   :  { %181 = vmax.xlane.f32.xlu0 %v180_v24  ;;  %v175_v25 = vpop.f32.mrf.mxu1 }
 0x1a2   :  { %v176_v26 = vadd.f32 %v216_v20, %v175_v25 }
 0x1a3   :  { %v247_v27 = vpop.f32.mrf.mxu1 }
 0x1a4   :  { %v183_v28 = vsel %vm179_vm3, %v176_v26, -inf }
 0x1a5   :  { %184 = vmax.xlane.f32.xlu0 %v183_v28 }
 0x22a   :  { %v182_v29 = vpop.xlane.xlu0 %181 }
 0x22b   :  { %v186_v30 = vsub.f32 %v173_v22, %v182_v29 }
 0x22d   :  { %v188_v31 = vmul.f32 1.442695, %v186_v30 }
 0x22e   :  { %v185_v32 = vpop.xlane.xlu0 %184 }
 0x22f   :  { %256 = vpow2.f32 %v188_v31  ;;  %v187_v33 = vsub.f32 %v176_v26, %v185_v32 }
 0x231   :  { %v190_v34 = vmul.f32 1.442695, %v187_v33 }
 0x233   :  { %258 = vpow2.f32 %v190_v34 }
 0x23c   :  { %v257_v35 = vpop.eup %256 }
 0x23d   :  { %v192_v36 = vsel %vm179_vm3, %v257_v35, 0.0 }
 0x23e   :  { %193 = vadd.xlane.f32.xlu1 %v192_v36 }
 0x240   :  { %v259_v37 = vpop.eup %258 }
 0x241   :  { %v195_v38 = vsel %vm179_vm3, %v259_v37, 0.0 }
 0x242   :  { %196 = vadd.xlane.f32.xlu1 %v195_v38 }
 0x2c7   :  { %v194_v39 = vpop.xlane.xlu1 %193 }
 0x2c8   :  { %260 = vlog2.f32 %v194_v39 }
 0x2cb   :  { %v197_v40 = vpop.xlane.xlu1 %196 }
 0x2cc   :  { %262 = vlog2.f32 %v197_v40 }
 0x2d5   :  { %v261_v41 = vpop.eup %260 }
 0x2d6   :  { %v199_v42 = vmul.f32 0.6931472, %v261_v41 }
 0x2d8   :  { %v202_v43 = vsub.f32 %v186_v30, %v199_v42 }
 0x2d9   :  { %v263_v44 = vpop.eup %262 }
 0x2da   :  { %204 = vst.msk [vmem:[%s343_s5] sm:$0xff] %vm179_vm3, %v202_v43  ;;  %v201_v45 = vmul.f32 0.6931472, %v263_v44 }
 0x2dc   :  { %v203_v46 = vsub.f32 %v187_v33, %v201_v45 }
 0x2de   :  { %205 = vst.msk [vmem:[%s343_s5 + $0x8] sm:$0xff] %vm179_vm3, %v203_v46 }

</bundles_post_ra>
